<compile_context>
chip_gen: v7x
topology: tpu7x:2x2x1
jax: 0.10.0
libtpu: 0.0.40
codegen_flags: <defaults>
</compile_context>

<pallas_src>
import jax
import jax.numpy as jnp
from jax.experimental import pallas as pl
from jax.experimental.pallas import tpu as pltpu

_LANE = 128
_MAX_COLS = 4096                         # cap on lane width (multiple of 128)
_TARGET_TILE_BYTES = 4 * 1024 * 1024     # ~4 MiB per tile per array
_SPLIT_THRESHOLD_BYTES = 2 * 1024 * 1024 # above this, force >=2 (even) steps
_VMEM_LIMIT_BYTES = 32 * 1024 * 1024     # 4 x 4 MiB tiles + slack, OK on all gens


def _affine_kernel(scale_ref, bias_ref, x_ref, o_ref):
    # scale_ref / bias_ref: (1,) f32 scalars in SMEM; x_ref / o_ref: (tile_r, C) VMEM.
    x = x_ref[...].astype(jnp.float32)
    o_ref[...] = (x * scale_ref[0] + bias_ref[0]).astype(o_ref.dtype)


def _sublane(dtype) -> int:
    # Minimum sublane multiple per dtype (f32: 8, bf16: 16, int8/fp8: 32).
    return {4: 8, 2: 16, 1: 32}.get(jnp.dtype(dtype).itemsize, 8)


def _round_up(v: int, m: int) -> int:
    return ((v + m - 1) // m) * m


def _choose_cols(n: int) -> int:
    """Largest multiple of 128 that divides n, capped at _MAX_COLS (0 if none)."""
    best = 0
    c = _LANE
    limit = min(n, _MAX_COLS)
    while c <= limit:
        if n % c == 0:
            best = c
        c += _LANE
    return best


def _pick_tile_rows(R: int, C: int, dtype) -> int:
    """Row-tile size: ~4 MiB tiles, even >=2-step grid for large arrays (v7x)."""
    itemsize = jnp.dtype(dtype).itemsize
    sub = _sublane(dtype)
    row_bytes = max(1, C * itemsize)
    total_bytes = R * row_bytes

    target_rows = max(1, _TARGET_TILE_BYTES // row_bytes)
    steps = 1 if target_rows >= R else pl.cdiv(R, target_rows)

    # v7x megacore only helps with >=2 grid steps; prefer an even count.
    if total_bytes > _SPLIT_THRESHOLD_BYTES:
        steps = max(2, steps + (steps % 2))

    if steps <= 1:
        return R

    tile_r = min(R, _round_up(pl.cdiv(R, steps), sub))
    # Legality guard: block rows must be a multiple of the sublane count or
    # equal the full row extent.
    if tile_r != R and tile_r % sub != 0:
        tile_r = R
    return tile_r


def _run_affine(x2d: jax.Array, scale: jax.Array, bias: jax.Array) -> jax.Array:
    R, C = x2d.shape
    tile_r = _pick_tile_rows(R, C, x2d.dtype)
    grid = (pl.cdiv(R, tile_r),)

    n = R * C
    itemsize = x2d.dtype.itemsize
    cost = pl.CostEstimate(
        flops=2 * n, transcendentals=0,
        bytes_accessed=2 * n * itemsize + 2 * 4)

    return pl.pallas_call(
        _affine_kernel,
        out_shape=jax.ShapeDtypeStruct((R, C), x2d.dtype),
        grid=grid,
        in_specs=[
            pl.BlockSpec(memory_space=pltpu.MemorySpace.SMEM),   # scale (f32)
            pl.BlockSpec(memory_space=pltpu.MemorySpace.SMEM),   # bias  (f32)
            pl.BlockSpec((tile_r, C), lambda i: (i, 0)),         # x tile (VMEM)
        ],
        out_specs=pl.BlockSpec((tile_r, C), lambda i: (i, 0)),
        compiler_params=pltpu.CompilerParams(
            dimension_semantics=("parallel",),
            vmem_limit_bytes=_VMEM_LIMIT_BYTES),
        cost_estimate=cost,
    )(scale, bias, x2d)


def normalize_layer_mnist(x: jax.Array, means: jax.Array, sds: jax.Array) -> jax.Array:
    """x: (B, C, H, W) NCHW. means/sds: length-1 (MNIST has C == 1)."""
    if means.size != 1 or sds.size != 1:
        # TODO(synk): per-channel (C > 1) means/sds would need a per-channel
        # scalar lookup; this MNIST layer is the scalar (len == 1) case.
        raise ValueError("normalize_layer_mnist expects length-1 means/sds (MNIST C == 1)")

    orig_shape = x.shape
    n = x.size

    # Fold (x - mean) / sd into one mul + add; keep the folded constants in
    # float32 SMEM and only cast the result back to x.dtype.
    m = means.reshape(-1)[:1].astype(jnp.float32)
    s = sds.reshape(-1)[:1].astype(jnp.float32)
    scale = 1.0 / s
    bias = -m / s

    cols = _choose_cols(n)
    if cols > 0:
        # Lane-dense path: last dim is a multiple of 128 -> unmasked stores.
        out2d = _run_affine(x.reshape(n // cols, cols), scale, bias)
        return out2d.reshape(orig_shape)

    # No multiple-of-128 factorization: keep the natural trailing dim and let
    # Pallas mask the ragged last row block. No jnp.pad, no post-kernel slice,
    # so no extra HBM round trips (block last dim == full array last dim is legal).
    if x.ndim >= 2:
        last = orig_shape[-1]
        x2d = x.reshape(n // last, last)
    else:
        x2d = x.reshape(1, n)
    out2d = _run_affine(x2d, scale, bias)
    return out2d.reshape(orig_shape)


if __name__ == "__main__":
    # MNIST normalization constants (deterministic "parameters").
    means = jnp.array([0.1307], dtype=jnp.float32)
    sds = jnp.array([0.3081], dtype=jnp.float32)

    key = jax.random.PRNGKey(0)
    k1, k2 = jax.random.split(key)

    # Primary input: MNIST-shaped batch, NCHW (exercises the lane-dense path).
    x = jax.random.uniform(k1, (8, 1, 28, 28), dtype=jnp.float32)
    out = jax.block_until_ready(normalize_layer_mnist(x, means, sds))
    ref = (x - means) / sds
    assert out.shape == x.shape and out.dtype == x.dtype
    assert jnp.allclose(out, ref, atol=1e-5, rtol=1e-5)

    # Secondary check: element count with no factor of 128 (ragged-block path).
    x2 = jax.random.uniform(k2, (2, 1, 28, 28), dtype=jnp.float32)
    out2 = jax.block_until_ready(normalize_layer_mnist(x2, means, sds))
    ref2 = (x2 - means) / sds
    assert out2.shape == x2.shape and out2.dtype == x2.dtype
    assert jnp.allclose(out2, ref2, atol=1e-5, rtol=1e-5)

    print("KERNEL_OK")
</pallas_src>

<mosaic_0001>
module attributes {stable_mosaic.version = 11 : i64} {
  func.func @_affine_kernel(%arg0: i32, %arg1: memref<1xf32, #tpu.memory_space<smem>>, %arg2: memref<1xf32, #tpu.memory_space<smem>>, %arg3: memref<7x896xf32, #tpu.memory_space<vmem>>, %arg4: memref<7x896xf32, #tpu.memory_space<vmem>>) attributes {dimension_semantics = [#tpu.dimension_semantics<parallel>], iteration_bounds = array<i64: 1>, scalar_prefetch = 0 : i64, scratch_operands = 0 : i64, tpu.core_type = #tpu.core_type<tc>, window_params = [{transform_indices = @transform_0, window_bounds = array<i64: 1>}, {transform_indices = @transform_1, window_bounds = array<i64: 1>}, {transform_indices = @transform_2, window_bounds = array<i64: 7, 896>}, {transform_indices = @transform_3, window_bounds = array<i64: 7, 896>}]} {
    %c0 = arith.constant 0 : index
    %c0_0 = arith.constant 0 : index
    %0 = vector.load %arg3[%c0, %c0_0] : memref<7x896xf32, #tpu.memory_space<vmem>>, vector<7x896xf32>
    %c0_1 = arith.constant 0 : index
    %1 = memref.load %arg1[%c0_1] : memref<1xf32, #tpu.memory_space<smem>>
    %2 = vector.broadcast %1 : f32 to vector<7x896xf32>
    %3 = arith.mulf %0, %2 : vector<7x896xf32>
    %c0_2 = arith.constant 0 : index
    %4 = memref.load %arg2[%c0_2] : memref<1xf32, #tpu.memory_space<smem>>
    %5 = vector.broadcast %4 : f32 to vector<7x896xf32>
    %6 = arith.addf %3, %5 : vector<7x896xf32>
    %c0_3 = arith.constant 0 : index
    %c0_4 = arith.constant 0 : index
    %7 = vector.load %arg4[%c0_3, %c0_4] : memref<7x896xf32, #tpu.memory_space<vmem>>, vector<7x896xf32>
    tpu.vector_store %arg4[%c0_3, %c0_4], %6 {strides = array<i32>} : memref<7x896xf32, #tpu.memory_space<vmem>>, vector<7x896xf32>,
    return
  }
  func.func @transform_0(%arg0: i32) -> i32 {
    %c0_i32 = arith.constant 0 : i32
    %c0_i32_0 = arith.constant 0 : i32
    return %c0_i32 : i32
  }
  func.func @transform_1(%arg0: i32) -> i32 {
    %c0_i32 = arith.constant 0 : i32
    %c0_i32_0 = arith.constant 0 : i32
    return %c0_i32 : i32
  }
  func.func @transform_2(%arg0: i32) -> (i32, i32) {
    %c0_i32 = arith.constant 0 : i32
    %c0_i32_0 = arith.constant 0 : i32
    return %arg0, %c0_i32 : i32, i32
  }
  func.func @transform_3(%arg0: i32) -> (i32, i32) {
    %c0_i32 = arith.constant 0 : i32
    %c0_i32_0 = arith.constant 0 : i32
    return %arg0, %c0_i32 : i32, i32
  }
}

</mosaic_0001>

<bundles_post_ra>
// kernel: tpu_custom_call.1
= control target key start
LH: loop header
LB: loop body
LE: loop exit
PB: predicated region body
PF: predicated region fallthrough
CT: control target
= control target key end

     0   :  { %10 = vsyncpa [#allocation5], 0  ;;  %s178_s0 = inlined_call_operand.<no memory space> [shape: f32[1], index: 0, kind: input, shape index: {}]   ;;  %s179_s1 = inlined_call_operand.<no memory space> [shape: f32[1], index: 1, kind: input, shape index: {}]   ;;  %s180_s2 = inlined_call_operand.hbm [shape: f32[7,896], index: 2, kind: input, shape index: {}]   ;;  %s181_s3 = inlined_call_operand.hbm [shape: f32[7,896], index: 3, kind: output, shape index: {}]  }
   0x1   :  { %11 = vsyncpa [#allocation6], 0  ;;  %s126_s12 = smov [#allocation4]   ;;  %s78_s16 = scalar_lea.hbm %s180_s2, 896 }
   0x2   :  { %s22_s13 = sshll.u32 %s126_s12, 4  ;;  %p79_p0 = scmp.ne.s32.totalorder %s180_s2, %s78_s16  ;;  %s23_s13 = int_to_ptr.vmem [resolvable:$true] %s22_s13 }
   0x3   :  { %p82_p1 = scmp.lt.u32.totalorder %s78_s16, %s180_s2 }
   0x5   :  { %p84_p2 = pnand %p82_p1, %p79_p0 }
   0x7   :  { %87 = shalt.err (!%p84_p2)
}
   0x8   :  { %s88_s21 = scalar_lea.vmem %s23_s13, 896  ;;  %p93_p4 = scmp.lt.s32.totalorder %s23_s13, %s23_s13 }
   0x9   :  { %p89_p3 = scmp.ne.s32.totalorder %s23_s13, %s88_s21  ;;  %p94_p5 = scmp.lt.s32.totalorder %s88_s21, %s88_s21 }
   0xb   :  { %p95_p6 = por %p94_p5, %p93_p4 }
   0xd   :  { %p96_p7 = pnand %p95_p6, %p89_p3 }
   0xf   :  { %99 = shalt.err (!%p96_p7)
}
  0x10   :  { %25 = dma.hbm_to_vmem [thread:$0]  %s180_s2, 896, %s23_s13, [#allocation5]  }
  0x11   :  { %122 = dma.done.wait [#allocation5], 896  }
  0x12   :  { %123 = vsyncadd [#allocation5], 4294966400  ;;  %v37_v0 = vstv %s178_s0  ;;  %v29_v1 = vld [vmem:[#allocation4] sm:$0x7f]  ;;  %v46_v2 = vstv %s179_s1  ;;  %v30_v3 = vld [vmem:[#allocation4 + $0x8] sm:$0x7f] }
  0x13   :  { %v31_v4 = vld [vmem:[#allocation4 + $0x10] sm:$0x7f]  ;;  %v38_v5 = vmul.f32 %v37_v0, %v29_v1  ;;  %v39_v6 = vmul.f32 %v37_v0, %v30_v3  ;;  %v32_v8 = vld [vmem:[#allocation4 + $0x18] sm:$0x7f]  ;;  %v33_v9 = vld [vmem:[#allocation4 + $0x20] sm:$0x7f] }
  0x14   :  { %v40_v7 = vmul.f32 %v37_v0, %v31_v4  ;;  %v34_v10 = vld [vmem:[#allocation4 + $0x28] sm:$0x7f]  ;;  %v41_v11 = vmul.f32 %v37_v0, %v32_v8  ;;  %v42_v12 = vmul.f32 %v37_v0, %v33_v9  ;;  %v35_v14 = vld [vmem:[#allocation4 + $0x30] sm:$0x7f]  ;;  %s127_s2 = smov [#allocation7]  }
  0x15   :  { %v43_v13 = vmul.f32 %v37_v0, %v34_v10  ;;  %s67_s28 = sshll.u32 %s127_s2, 4  ;;  %v47_v15 = vadd.f32 %v46_v2, %v38_v5  ;;  %v48_v16 = vadd.f32 %v46_v2, %v39_v6  ;;  %v44_v18 = vmul.f32 %v37_v0, %v35_v14  ;;  %s68_s28 = int_to_ptr.vmem [resolvable:$true] %s67_s28 }
  0x16   :  { %v49_v17 = vadd.f32 %v46_v2, %v40_v7  ;;  %v50_v19 = vadd.f32 %v46_v2, %v41_v11  ;;  %v51_v20 = vadd.f32 %v46_v2, %v42_v12  ;;  %s100_s0 = scalar_lea.vmem %s68_s28, 896  ;;  %p105_p9 = scmp.lt.s32.totalorder %s68_s28, %s68_s28 }
  0x17   :  { %v52_v21 = vadd.f32 %v46_v2, %v43_v13  ;;  %54 = vst [vmem:[#allocation7] sm:$0x7f] %v47_v15  ;;  %55 = vst [vmem:[#allocation7 + $0x8] sm:$0x7f] %v48_v16  ;;  %v53_v22 = vadd.f32 %v46_v2, %v44_v18  ;;  %p101_p8 = scmp.ne.s32.totalorder %s68_s28, %s100_s0  ;;  %p106_p10 = scmp.lt.s32.totalorder %s100_s0, %s100_s0 }
  0x18   :  { %56 = vst [vmem:[#allocation7 + $0x10] sm:$0x7f] %v49_v17  ;;  %57 = vst [vmem:[#allocation7 + $0x18] sm:$0x7f] %v50_v19 }
  0x19   :  { %58 = vst [vmem:[#allocation7 + $0x20] sm:$0x7f] %v51_v20  ;;  %59 = vst [vmem:[#allocation7 + $0x28] sm:$0x7f] %v52_v21  ;;  %p107_p11 = por %p106_p10, %p105_p9 }
  0x1a   :  { %60 = vst [vmem:[#allocation7 + $0x30] sm:$0x7f] %v53_v22 }
  0x1b   :  { %p108_p12 = pnand %p107_p11, %p101_p8 }
  0x1d   :  { %111 = shalt.err (!%p108_p12)
}
  0x1e   :  { %s112_s30 = scalar_lea.hbm %s181_s3, 896 }
  0x1f   :  { %p113_p13 = scmp.ne.s32.totalorder %s181_s3, %s112_s30  ;;  %p116_p0 = scmp.lt.u32.totalorder %s112_s30, %s181_s3 }
  0x21   :  { %p118_p1 = pnand %p116_p0, %p113_p13 }
  0x23   :  { %121 = shalt.err (!%p118_p1)
}
  0x24   :  { %70 = dma.vmem_to_hbm [thread:$0]  %s68_s28, 896, %s181_s3, [#allocation6]  }
  0x25   :  { %124 = dma.done.wait [#allocation6], 896  }
  0x26   :  { %125 = vsyncadd [#allocation6], 4294966400 }
  0x27   :  { %74 = vsyncpa [#allocation5], 1 }
  0x28   :  { %75 = vsyncpa [#allocation6], 1 }

</bundles_post_ra>
